<compile_context>
chip_gen: v6e
topology: v6e:2x2x1
jax: 0.10.0
libtpu: 0.0.40
codegen_flags: <defaults>
</compile_context>

<pallas_src>
import functools

import jax
import jax.numpy as jnp
from jax import lax
from jax.experimental import pallas as pl
from jax.experimental.pallas import tpu as pltpu

DEFAULT_MARGIN = 5.0
_BIG = 1e30  # finite "infinity" sentinel for masked max/min


def _round_up(x: int, m: int) -> int:
    return ((x + m - 1) // m) * m


def _bh_triplet_kernel(e_a_ref, e_c_ref, sqn_a_ref, sqn_ch_ref, lab_a_ref, lab_c_ref,
                       out_ref, hp_ref, hn_ref, *, tm, tn, margin):
    i = pl.program_id(0)              # anchor tile index (parallel)
    j = pl.program_id(1)              # candidate tile index (arbitrary / reduction)
    nc = pl.num_programs(1)

    @pl.when(j == 0)
    def _init():
        hp_ref[...] = jnp.full((1, tm), -_BIG, dtype=jnp.float32)
        hn_ref[...] = jnp.full((1, tm), _BIG, dtype=jnp.float32)

    # MXU: dot[c, a] = <e_c, e_a>, candidate-major so per-anchor reductions are sublane
    # reductions producing lane-dense (1, tm) vectors.  f32 accumulation always.
    dot = lax.dot_general(e_c_ref[...], e_a_ref[...], (((1,), (1,)), ((), ())),
                          preferred_element_type=jnp.float32)            # (tn, tm)

    # partial = 0.5*||c||^2 - <c,a>;  d^2 = 2*partial + ||a||^2 (applied at finalize;
    # both transforms are monotone per anchor so mining on `partial` is exact).
    partial = sqn_ch_ref[...] - dot                                       # (tn, tm)

    labels_equal = lab_c_ref[...] == lab_a_ref[...]                       # (tn, tm)

    # Hardest negative (running min).  Padded candidates carry sqn=+BIG -> never win.
    hn_tile = jnp.min(jnp.where(labels_equal, _BIG, partial), axis=0, keepdims=True)
    hn_ref[...] = jnp.minimum(hn_ref[...], hn_tile)

    # Hardest positive (running max).  Padded candidates have a unique sentinel label ->
    # never positives.  The self-pair only exists when the anchor and candidate tile
    # ranges overlap, so the iota/diag work is gated on that scalar condition.
    overlaps = jnp.logical_and(i * tm < (j + 1) * tn, j * tn < (i + 1) * tm)

    @pl.when(overlaps)
    def _pos_with_diag():
        c_glob = j * tn + lax.broadcasted_iota(jnp.int32, (tn, tm), 0)
        a_glob = i * tm + lax.broadcasted_iota(jnp.int32, (tn, tm), 1)
        pos = jnp.logical_and(labels_equal, c_glob != a_glob)
        hp_tile = jnp.max(jnp.where(pos, partial, -_BIG), axis=0, keepdims=True)
        hp_ref[...] = jnp.maximum(hp_ref[...], hp_tile)

    @pl.when(jnp.logical_not(overlaps))
    def _pos_no_diag():
        hp_tile = jnp.max(jnp.where(labels_equal, partial, -_BIG), axis=0, keepdims=True)
        hp_ref[...] = jnp.maximum(hp_ref[...], hp_tile)

    @pl.when(j == nc - 1)
    def _finalize():
        sqn_a = sqn_a_ref[...]                                            # (1, tm)
        # Reconstruct squared distances; clamp-at-0 after (monotone) mining == PyTorch's
        # per-element clamp.  "No positive" (-BIG accumulator) clamps to 0, matching torch.
        hp2 = jnp.maximum(2.0 * hp_ref[...] + sqn_a, 0.0)
        hn2 = jnp.maximum(2.0 * hn_ref[...] + sqn_a, 0.0)
        # zero-mask / 1e-16 sqrt trick only on the two (1,tm) result vectors (2*tm EUP ops).
        hp_zero = (hp2 == 0.0).astype(jnp.float32)
        hn_zero = (hn2 == 0.0).astype(jnp.float32)
        hp = (1.0 - hp_zero) * jnp.sqrt(hp2 + hp_zero * 1e-16)
        hn = (1.0 - hn_zero) * jnp.sqrt(hn2 + hn_zero * 1e-16)
        out_ref[...] = jnp.maximum(hp - hn + margin, 0.0)                 # lane-dense (1, tm)


def batch_hard_triplet_loss(embeddings: jax.Array, labels: jax.Array, *,
                            margin: float = DEFAULT_MARGIN,
                            tm: int | None = None, tn: int | None = None,
                            mxu_dtype=None,
                            cand_buffers: int | None = None,
                            vmem_limit_bytes: int | None = None) -> jax.Array:
    """embeddings: (B, D), labels: (B,) int -> scalar float32 triplet loss.

    tm / tn: anchor / candidate tile sizes (multiples of 128).  Defaults: tm=256
    (raise to 512-1024 on v6e; keep B_pad/tm >= 2 on v7x), tn = one candidate tile for
    typical batches (cap ~2048 rows / ~8 MiB double-buffer).  mxu_dtype=jnp.bfloat16
    stores the embeddings in bf16 (halves HBM traffic, ~3-4x MXU rate on v6e/v7x) while
    keeping norms/masks/accumulators in f32; leave None for exact f32 parity.
    cand_buffers=3 deepens the candidate-stream pipeline when DMA latency is exposed.
    """
    B, D = embeddings.shape
    D_pad = _round_up(D, 128)
    B128 = _round_up(B, 128)

    mxu_bytes = jnp.dtype(mxu_dtype if mxu_dtype is not None else embeddings.dtype).itemsize

    if tm is None:
        tm = min(256, B128)
    if tn is None:
        budget = 8 << 20  # ~8 MiB for the double-buffered candidate embedding block
        tn_cap = max(128, (budget // (2 * D_pad * mxu_bytes)) // 128 * 128)
        tn = max(128, min(B128, 2048, tn_cap))
    assert tm % 128 == 0 and tn % 128 == 0, "tile sizes must be multiples of 128"

    B_pad_a = _round_up(B, tm)   # anchors padded to a multiple of tm
    B_pad_c = _round_up(B, tn)   # candidates padded to a multiple of tn (no lcm blow-up)

    # Square norms once in f32 from the original embeddings (exact even with bf16 MXU feed).
    emb_f32 = embeddings.astype(jnp.float32)
    sqn = jnp.sum(emb_f32 * emb_f32, axis=1)

    # bf16-in-HBM when requested: cast in the wrapper so the dominant candidate DMA halves.
    emb = embeddings.astype(mxu_dtype) if mxu_dtype is not None else embeddings
    emb_a = jnp.pad(emb, ((0, B_pad_a - B), (0, D_pad - D)))
    emb_c = emb_a if B_pad_c == B_pad_a else jnp.pad(emb, ((0, B_pad_c - B), (0, D_pad - D)))

    lab = labels.astype(jnp.int32)
    pad_label = jnp.max(lab) + 1  # guaranteed distinct from every real label

    def _pad_labels(n):
        if n == B:
            return lab
        return jnp.concatenate([lab, jnp.full((n - B,), pad_label, dtype=jnp.int32)])

    lab_row = _pad_labels(B_pad_a).reshape(1, B_pad_a)   # anchor labels (lane view)
    lab_col = _pad_labels(B_pad_c).reshape(B_pad_c, 1)   # candidate labels (sublane view)

    sqn_row = jnp.pad(sqn, (0, B_pad_a - B)).reshape(1, B_pad_a)
    # Candidate square norms are pre-halved; padded rows get +BIG so they lose every min.
    sqn_col_half = jnp.pad(0.5 * sqn, (0, B_pad_c - B),
                           constant_values=_BIG).reshape(B_pad_c, 1)

    grid = (B_pad_a // tm, B_pad_c // tn)

    cand_spec_kwargs = {}
    if cand_buffers is not None:
        cand_spec_kwargs["pipeline_mode"] = pl.Buffered(cand_buffers)

    cp_kwargs = dict(dimension_semantics=("parallel", "arbitrary"))
    if vmem_limit_bytes is not None:
        cp_kwargs["vmem_limit_bytes"] = vmem_limit_bytes

    kernel = functools.partial(_bh_triplet_kernel, tm=tm, tn=tn, margin=float(margin))

    per_anchor = pl.pallas_call(
        kernel,
        out_shape=jax.ShapeDtypeStruct((1, B_pad_a), jnp.float32),
        grid_spec=pltpu.PrefetchScalarGridSpec(
            num_scalar_prefetch=0,
            grid=grid,
            in_specs=[
                pl.BlockSpec((tm, D_pad), lambda i, j: (i, 0)),                    # anchors
                pl.BlockSpec((tn, D_pad), lambda i, j: (j, 0), **cand_spec_kwargs),  # candidates
                pl.BlockSpec((1, tm), lambda i, j: (0, i)),                        # ||a||^2 row
                pl.BlockSpec((tn, 1), lambda i, j: (j, 0)),                        # 0.5||c||^2 col
                pl.BlockSpec((1, tm), lambda i, j: (0, i)),                        # anchor labels
                pl.BlockSpec((tn, 1), lambda i, j: (j, 0)),                        # cand labels
            ],
            out_specs=pl.BlockSpec((1, tm), lambda i, j: (0, i)),  # lane-dense per-anchor loss
            scratch_shapes=[pltpu.VMEM((1, tm), jnp.float32),      # running max (hardest pos)
                            pltpu.VMEM((1, tm), jnp.float32)],     # running min (hardest neg)
        ),
        compiler_params=pltpu.CompilerParams(**cp_kwargs),
    )(emb_a, emb_c, sqn_row, sqn_col_half, lab_row, lab_col)

    # Mean over the real anchors only (padded anchors excluded) — tiny XLA op.
    # NOTE: anchors with *no* negative in the batch get loss 0 here, whereas the PyTorch
    # row-max trick can yield a positive loss in that degenerate case.
    return jnp.mean(per_anchor[0, :B])


def _reference_loss(embeddings, labels, margin=DEFAULT_MARGIN):
    """Pure-JAX reference mirroring the PyTorch module exactly."""
    e = embeddings.astype(jnp.float32)
    dot = e @ e.T
    sq = jnp.diag(dot)
    d = sq[None, :] - 2.0 * dot + sq[:, None]
    d = jnp.maximum(d, 0.0)
    m = (d == 0.0).astype(jnp.float32)
    d = (1.0 - m) * jnp.sqrt(d + m * 1e-16)
    eye = jnp.eye(labels.shape[0], dtype=bool)
    leq = labels[None, :] == labels[:, None]
    m_ap = (leq & ~eye).astype(jnp.float32)
    m_an = (~leq).astype(jnp.float32)
    hp = jnp.max(m_ap * d, axis=1, keepdims=True)
    mx = jnp.max(d, axis=1, keepdims=True)
    hn = jnp.min(d + mx * (1.0 - m_an), axis=1, keepdims=True)
    return jnp.mean(jnp.maximum(hp - hn + margin, 0.0))


if __name__ == "__main__":
    # TODO(synk): the SentenceTransformer encoder itself is not reproduced; the kernel
    # consumes precomputed sentence embeddings, matching batch_hard_triplet_loss().
    key = jax.random.PRNGKey(0)

    # Test 1: small batch (single 128x128 tile after padding).
    B, D = 8, 32
    emb1 = jax.random.normal(key, (B, D), dtype=jnp.float32)
    lab1 = jnp.array([0, 0, 1, 1, 2, 2, 0, 1], dtype=jnp.int32)  # >=2 samples per class
    loss1 = batch_hard_triplet_loss(emb1, lab1)
    jax.block_until_ready(loss1)
    ref1 = _reference_loss(emb1, lab1)
    assert jnp.allclose(loss1, ref1, rtol=1e-4, atol=1e-4), (loss1, ref1)

    # Test 2: non-tile-aligned batch with default tiling (tm=256, single candidate tile).
    B2, D2 = 300, 40
    emb2 = jax.random.normal(jax.random.PRNGKey(1), (B2, D2), dtype=jnp.float32)
    lab2 = (jnp.arange(B2) % 5).astype(jnp.int32)
    loss2 = batch_hard_triplet_loss(emb2, lab2)
    jax.block_until_ready(loss2)
    ref2 = _reference_loss(emb2, lab2)
    assert jnp.allclose(loss2, ref2, rtol=1e-4, atol=1e-4), (loss2, ref2)

    # Test 3: force a 3x3 grid (multi candidate tiles) to exercise the streaming
    # accumulators and the overlap-gated diagonal exclusion on off-diagonal tiles.
    loss3 = batch_hard_triplet_loss(emb2, lab2, tm=128, tn=128)
    jax.block_until_ready(loss3)
    assert jnp.allclose(loss3, ref2, rtol=1e-4, atol=1e-4), (loss3, ref2)

    # Test 4: bf16 MXU feed + bf16 HBM storage (f32 norms/accumulation) — loose tolerance.
    loss4 = batch_hard_triplet_loss(emb2, lab2, mxu_dtype=jnp.bfloat16)
    jax.block_until_ready(loss4)
    assert jnp.abs(loss4 - ref2) < 0.25, (loss4, ref2)

    print("KERNEL_OK")
</pallas_src>

<mosaic_0001>
module attributes {stable_mosaic.version = 11 : i64} {
  func.func @_bh_triplet_kernel(%arg0: i32, %arg1: i32, %arg2: memref<128x128xf32, #tpu.memory_space<vmem>>, %arg3: memref<128x128xf32, #tpu.memory_space<vmem>>, %arg4: memref<1x128xf32, #tpu.memory_space<vmem>>, %arg5: memref<128x1xf32, #tpu.memory_space<vmem>>, %arg6: memref<1x128xi32, #tpu.memory_space<vmem>>, %arg7: memref<128x1xi32, #tpu.memory_space<vmem>>, %arg8: memref<1x128xf32, #tpu.memory_space<vmem>>, %arg9: memref<1x128xf32, #tpu.memory_space<vmem>>, %arg10: memref<1x128xf32, #tpu.memory_space<vmem>>) attributes {dimension_semantics = [#tpu.dimension_semantics<parallel>, #tpu.dimension_semantics<arbitrary>], iteration_bounds = array<i64: 1, 1>, scalar_prefetch = 0 : i64, scratch_operands = 2 : i64, tpu.core_type = #tpu.core_type<tc>, window_params = [{transform_indices = @transform_0, window_bounds = array<i64: 128, 128>}, {transform_indices = @transform_1, window_bounds = array<i64: 128, 128>}, {transform_indices = @transform_2, window_bounds = array<i64: 1, 128>}, {transform_indices = @transform_3, window_bounds = array<i64: 128, 1>}, {transform_indices = @transform_4, window_bounds = array<i64: 1, 128>}, {transform_indices = @transform_5, window_bounds = array<i64: 128, 1>}, {transform_indices = @transform_6, window_bounds = array<i64: 1, 128>}]} {
    %c0_i32 = arith.constant 0 : i32
    %0 = arith.cmpi eq, %arg1, %c0_i32 : i32
    %1 = arith.extui %0 : i1 to i32
    %c0_i32_0 = arith.constant 0 : i32
    %2 = arith.cmpi ne, %1, %c0_i32_0 : i32
    scf.if %2 {
      %cst_24 = arith.constant -1.000000e+30 : f32
      %38 = vector.broadcast %cst_24 : f32 to vector<1x128xf32>
      %c0_25 = arith.constant 0 : index
      %c0_26 = arith.constant 0 : index
      %39 = vector.load %arg9[%c0_25, %c0_26] : memref<1x128xf32, #tpu.memory_space<vmem>>, vector<1x128xf32>
      tpu.vector_store %arg9[%c0_25, %c0_26], %38 {strides = array<i32>} : memref<1x128xf32, #tpu.memory_space<vmem>>, vector<1x128xf32>,
      %cst_27 = arith.constant 1.000000e+30 : f32
      %40 = vector.broadcast %cst_27 : f32 to vector<1x128xf32>
      %c0_28 = arith.constant 0 : index
      %c0_29 = arith.constant 0 : index
      %41 = vector.load %arg10[%c0_28, %c0_29] : memref<1x128xf32, #tpu.memory_space<vmem>>, vector<1x128xf32>
      tpu.vector_store %arg10[%c0_28, %c0_29], %40 {strides = array<i32>} : memref<1x128xf32, #tpu.memory_space<vmem>>, vector<1x128xf32>,
    } else {
    }
    %c0 = arith.constant 0 : index
    %c0_1 = arith.constant 0 : index
    %3 = vector.load %arg3[%c0, %c0_1] : memref<128x128xf32, #tpu.memory_space<vmem>>, vector<128x128xf32>
    %c0_2 = arith.constant 0 : index
    %c0_3 = arith.constant 0 : index
    %4 = vector.load %arg2[%c0_2, %c0_3] : memref<128x128xf32, #tpu.memory_space<vmem>>, vector<128x128xf32>
    %cst = arith.constant dense<0.000000e+00> : vector<128x128xf32>
    %5 = tpu.matmul %3, %4, %cst {dimension_numbers = #tpu.dot_dimension_numbers<[1], [1], [0], [0], [0, 0, 1, 0], [], []>} : vector<128x128xf32>, vector<128x128xf32>, vector<128x128xf32> -> vector<128x128xf32>
    %c0_4 = arith.constant 0 : index
    %c0_5 = arith.constant 0 : index
    %6 = vector.load %arg5[%c0_4, %c0_5] : memref<128x1xf32, #tpu.memory_space<vmem>>, vector<128x1xf32>
    %7 = vector.broadcast %6 : vector<128x1xf32> to vector<128x128xf32>
    %8 = arith.subf %7, %5 : vector<128x128xf32>
    %c0_6 = arith.constant 0 : index
    %c0_7 = arith.constant 0 : index
    %9 = vector.load %arg7[%c0_6, %c0_7] : memref<128x1xi32, #tpu.memory_space<vmem>>, vector<128x1xi32>
    %c0_8 = arith.constant 0 : index
    %c0_9 = arith.constant 0 : index
    %10 = vector.load %arg6[%c0_8, %c0_9] : memref<1x128xi32, #tpu.memory_space<vmem>>, vector<1x128xi32>
    %11 = vector.broadcast %9 : vector<128x1xi32> to vector<128x128xi32>
    %12 = vector.broadcast %10 : vector<1x128xi32> to vector<128x128xi32>
    %13 = arith.cmpi eq, %11, %12 : vector<128x128xi32>
    %cst_10 = arith.constant 1.000000e+30 : f32
    %14 = vector.broadcast %cst_10 : f32 to vector<128x128xf32>
    %15 = arith.select %13, %14, %8 : vector<128x128xi1>, vector<128x128xf32>
    %cst_11 = arith.constant dense<0x7F800000> : vector<128xf32>
    %16 = vector.multi_reduction <minimumf>, %15, %cst_11 [0] : vector<128x128xf32> to vector<128xf32>
    %17 = vector.shape_cast %16 : vector<128xf32> to vector<1x128xf32>
    %c0_12 = arith.constant 0 : index
    %c0_13 = arith.constant 0 : index
    %18 = vector.load %arg10[%c0_12, %c0_13] : memref<1x128xf32, #tpu.memory_space<vmem>>, vector<1x128xf32>
    %19 = arith.minimumf %18, %17 : vector<1x128xf32>
    %c0_14 = arith.constant 0 : index
    %c0_15 = arith.constant 0 : index
    %20 = vector.load %arg10[%c0_14, %c0_15] : memref<1x128xf32, #tpu.memory_space<vmem>>, vector<1x128xf32>
    tpu.vector_store %arg10[%c0_14, %c0_15], %19 {strides = array<i32>} : memref<1x128xf32, #tpu.memory_space<vmem>>, vector<1x128xf32>,
    %c128_i32 = arith.constant 128 : i32
    %21 = arith.muli %arg0, %c128_i32 : i32
    %c1_i32 = arith.constant 1 : i32
    %22 = arith.addi %arg1, %c1_i32 : i32
    %c128_i32_16 = arith.constant 128 : i32
    %23 = arith.muli %22, %c128_i32_16 : i32
    %24 = arith.cmpi slt, %21, %23 : i32
    %c128_i32_17 = arith.constant 128 : i32
    %25 = arith.muli %arg1, %c128_i32_17 : i32
    %c1_i32_18 = arith.constant 1 : i32
    %26 = arith.addi %arg0, %c1_i32_18 : i32
    %c128_i32_19 = arith.constant 128 : i32
    %27 = arith.muli %26, %c128_i32_19 : i32
    %28 = arith.cmpi slt, %25, %27 : i32
    %29 = arith.andi %24, %28 : i1
    %30 = arith.extui %29 : i1 to i32
    %c0_i32_20 = arith.constant 0 : i32
    %31 = arith.cmpi ne, %30, %c0_i32_20 : i32
    scf.if %31 {
      %c128_i32_24 = arith.constant 128 : i32
      %38 = arith.muli %arg1, %c128_i32_24 : i32
      %39 = tpu.iota {dimensions = array<i32: 0>} : vector<128x128xi32>
      %40 = vector.broadcast %38 : i32 to vector<128x128xi32>
      %41 = arith.addi %40, %39 : vector<128x128xi32>
      %c128_i32_25 = arith.constant 128 : i32
      %42 = arith.muli %arg0, %c128_i32_25 : i32
      %43 = tpu.iota {dimensions = array<i32: 1>} : vector<128x128xi32>
      %44 = vector.broadcast %42 : i32 to vector<128x128xi32>
      %45 = arith.addi %44, %43 : vector<128x128xi32>
      %46 = arith.cmpi ne, %41, %45 : vector<128x128xi32>
      %47 = arith.andi %13, %46 : vector<128x128xi1>
      %cst_26 = arith.constant -1.000000e+30 : f32
      %48 = vector.broadcast %cst_26 : f32 to vector<128x128xf32>
      %49 = arith.select %47, %8, %48 : vector<128x128xi1>, vector<128x128xf32>
      %cst_27 = arith.constant dense<0xFF800000> : vector<128xf32>
      %50 = vector.multi_reduction <maximumf>, %49, %cst_27 [0] : vector<128x128xf32> to vector<128xf32>
      %51 = vector.shape_cast %50 : vector<128xf32> to vector<1x128xf32>
      %c0_28 = arith.constant 0 : index
      %c0_29 = arith.constant 0 : index
      %52 = vector.load %arg9[%c0_28, %c0_29] : memref<1x128xf32, #tpu.memory_space<vmem>>, vector<1x128xf32>
      %53 = arith.maximumf %52, %51 : vector<1x128xf32>
      %c0_30 = arith.constant 0 : index
      %c0_31 = arith.constant 0 : index
      %54 = vector.load %arg9[%c0_30, %c0_31] : memref<1x128xf32, #tpu.memory_space<vmem>>, vector<1x128xf32>
      tpu.vector_store %arg9[%c0_30, %c0_31], %53 {strides = array<i32>} : memref<1x128xf32, #tpu.memory_space<vmem>>, vector<1x128xf32>,
    } else {
    }
    %true = arith.constant true
    %32 = arith.xori %29, %true : i1
    %33 = arith.extui %32 : i1 to i32
    %c0_i32_21 = arith.constant 0 : i32
    %34 = arith.cmpi ne, %33, %c0_i32_21 : i32
    scf.if %34 {
      %cst_24 = arith.constant -1.000000e+30 : f32
      %38 = vector.broadcast %cst_24 : f32 to vector<128x128xf32>
      %39 = arith.select %13, %8, %38 : vector<128x128xi1>, vector<128x128xf32>
      %cst_25 = arith.constant dense<0xFF800000> : vector<128xf32>
      %40 = vector.multi_reduction <maximumf>, %39, %cst_25 [0] : vector<128x128xf32> to vector<128xf32>
      %41 = vector.shape_cast %40 : vector<128xf32> to vector<1x128xf32>
      %c0_26 = arith.constant 0 : index
      %c0_27 = arith.constant 0 : index
      %42 = vector.load %arg9[%c0_26, %c0_27] : memref<1x128xf32, #tpu.memory_space<vmem>>, vector<1x128xf32>
      %43 = arith.maximumf %42, %41 : vector<1x128xf32>
      %c0_28 = arith.constant 0 : index
      %c0_29 = arith.constant 0 : index
      %44 = vector.load %arg9[%c0_28, %c0_29] : memref<1x128xf32, #tpu.memory_space<vmem>>, vector<1x128xf32>
      tpu.vector_store %arg9[%c0_28, %c0_29], %43 {strides = array<i32>} : memref<1x128xf32, #tpu.memory_space<vmem>>, vector<1x128xf32>,
    } else {
    }
    %c0_i32_22 = arith.constant 0 : i32
    %35 = arith.cmpi eq, %arg1, %c0_i32_22 : i32
    %36 = arith.extui %35 : i1 to i32
    %c0_i32_23 = arith.constant 0 : i32
    %37 = arith.cmpi ne, %36, %c0_i32_23 : i32
    scf.if %37 {
      %c0_24 = arith.constant 0 : index
      %c0_25 = arith.constant 0 : index
      %38 = vector.load %arg4[%c0_24, %c0_25] : memref<1x128xf32, #tpu.memory_space<vmem>>, vector<1x128xf32>
      %c0_26 = arith.constant 0 : index
      %c0_27 = arith.constant 0 : index
      %39 = vector.load %arg9[%c0_26, %c0_27] : memref<1x128xf32, #tpu.memory_space<vmem>>, vector<1x128xf32>
      %cst_28 = arith.constant 2.000000e+00 : f32
      %40 = vector.broadcast %cst_28 : f32 to vector<1x128xf32>
      %41 = arith.mulf %40, %39 : vector<1x128xf32>
      %42 = arith.addf %41, %38 : vector<1x128xf32>
      %cst_29 = arith.constant 0.000000e+00 : f32
      %43 = vector.broadcast %cst_29 : f32 to vector<1x128xf32>
      %44 = arith.maximumf %42, %43 : vector<1x128xf32>
      %c0_30 = arith.constant 0 : index
      %c0_31 = arith.constant 0 : index
      %45 = vector.load %arg10[%c0_30, %c0_31] : memref<1x128xf32, #tpu.memory_space<vmem>>, vector<1x128xf32>
      %cst_32 = arith.constant 2.000000e+00 : f32
      %46 = vector.broadcast %cst_32 : f32 to vector<1x128xf32>
      %47 = arith.mulf %46, %45 : vector<1x128xf32>
      %48 = arith.addf %47, %38 : vector<1x128xf32>
      %cst_33 = arith.constant 0.000000e+00 : f32
      %49 = vector.broadcast %cst_33 : f32 to vector<1x128xf32>
      %50 = arith.maximumf %48, %49 : vector<1x128xf32>
      %cst_34 = arith.constant 0.000000e+00 : f32
      %51 = vector.broadcast %cst_34 : f32 to vector<1x128xf32>
      %52 = arith.cmpf oeq, %44, %51 : vector<1x128xf32>
      %53 = arith.extui %52 : vector<1x128xi1> to vector<1x128xi32>
      %54 = arith.sitofp %53 : vector<1x128xi32> to vector<1x128xf32>
      %cst_35 = arith.constant 0.000000e+00 : f32
      %55 = vector.broadcast %cst_35 : f32 to vector<1x128xf32>
      %56 = arith.cmpf oeq, %50, %55 : vector<1x128xf32>
      %57 = arith.extui %56 : vector<1x128xi1> to vector<1x128xi32>
      %58 = arith.sitofp %57 : vector<1x128xi32> to vector<1x128xf32>
      %cst_36 = arith.constant 1.000000e+00 : f32
      %59 = vector.broadcast %cst_36 : f32 to vector<1x128xf32>
      %60 = arith.subf %59, %54 : vector<1x128xf32>
      %cst_37 = arith.constant 1.000000e-16 : f32
      %61 = vector.broadcast %cst_37 : f32 to vector<1x128xf32>
      %62 = arith.mulf %54, %61 : vector<1x128xf32>
      %63 = arith.addf %44, %62 : vector<1x128xf32>
      %64 = math.sqrt %63 : vector<1x128xf32>
      %65 = arith.mulf %60, %64 : vector<1x128xf32>
      %cst_38 = arith.constant 1.000000e+00 : f32
      %66 = vector.broadcast %cst_38 : f32 to vector<1x128xf32>
      %67 = arith.subf %66, %58 : vector<1x128xf32>
      %cst_39 = arith.constant 1.000000e-16 : f32
      %68 = vector.broadcast %cst_39 : f32 to vector<1x128xf32>
      %69 = arith.mulf %58, %68 : vector<1x128xf32>
      %70 = arith.addf %50, %69 : vector<1x128xf32>
      %71 = math.sqrt %70 : vector<1x128xf32>
      %72 = arith.mulf %67, %71 : vector<1x128xf32>
      %73 = arith.subf %65, %72 : vector<1x128xf32>
      %cst_40 = arith.constant 5.000000e+00 : f32
      %74 = vector.broadcast %cst_40 : f32 to vector<1x128xf32>
      %75 = arith.addf %73, %74 : vector<1x128xf32>
      %cst_41 = arith.constant 0.000000e+00 : f32
      %76 = vector.broadcast %cst_41 : f32 to vector<1x128xf32>
      %77 = arith.maximumf %75, %76 : vector<1x128xf32>
      %c0_42 = arith.constant 0 : index
      %c0_43 = arith.constant 0 : index
      %78 = vector.load %arg8[%c0_42, %c0_43] : memref<1x128xf32, #tpu.memory_space<vmem>>, vector<1x128xf32>
      tpu.vector_store %arg8[%c0_42, %c0_43], %77 {strides = array<i32>} : memref<1x128xf32, #tpu.memory_space<vmem>>, vector<1x128xf32>,
    } else {
    }
    return
  }
  func.func @transform_0(%arg0: i32, %arg1: i32) -> (i32, i32) {
    %c0_i32 = arith.constant 0 : i32
    %c0_i32_0 = arith.constant 0 : i32
    return %arg0, %c0_i32 : i32, i32
  }
  func.func @transform_1(%arg0: i32, %arg1: i32) -> (i32, i32) {
    %c0_i32 = arith.constant 0 : i32
    %c0_i32_0 = arith.constant 0 : i32
    return %arg1, %c0_i32 : i32, i32
  }
  func.func @transform_2(%arg0: i32, %arg1: i32) -> (i32, i32) {
    %c0_i32 = arith.constant 0 : i32
    %c0_i32_0 = arith.constant 0 : i32
    return %c0_i32, %arg0 : i32, i32
  }
  func.func @transform_3(%arg0: i32, %arg1: i32) -> (i32, i32) {
    %c0_i32 = arith.constant 0 : i32
    %c0_i32_0 = arith.constant 0 : i32
    return %arg1, %c0_i32 : i32, i32
  }
  func.func @transform_4(%arg0: i32, %arg1: i32) -> (i32, i32) {
    %c0_i32 = arith.constant 0 : i32
    %c0_i32_0 = arith.constant 0 : i32
    return %c0_i32, %arg0 : i32, i32
  }
  func.func @transform_5(%arg0: i32, %arg1: i32) -> (i32, i32) {
    %c0_i32 = arith.constant 0 : i32
    %c0_i32_0 = arith.constant 0 : i32
    return %arg1, %c0_i32 : i32, i32
  }
  func.func @transform_6(%arg0: i32, %arg1: i32) -> (i32, i32) {
    %c0_i32 = arith.constant 0 : i32
    %c0_i32_0 = arith.constant 0 : i32
    return %c0_i32, %arg0 : i32, i32
  }
}

</mosaic_0001>

<bundles_post_ra>
// kernel: tpu_custom_call.1
= control target key start
LH: loop header
LB: loop body
LE: loop exit
PB: predicated region body
PF: predicated region fallthrough
CT: control target
= control target key end

     0   :  { %v823_v5 = vmov 0   ;;  %s1463_s0 = inlined_call_operand.vmem [shape: f32[128,128], index: 0, kind: input, shape index: {}]   ;;  %s1464_s1 = inlined_call_operand.vmem [shape: f32[128,128], index: 1, kind: input, shape index: {}]   ;;  %s1465_s2 = inlined_call_operand.vmem [shape: f32[1,128], index: 2, kind: input, shape index: {}]   ;;  %s1466_s3 = inlined_call_operand.vmem [shape: f32[128,1], index: 3, kind: input, shape index: {}]   ;;  %s1467_s4 = inlined_call_operand.vmem [shape: s32[1,128], index: 4, kind: input, shape index: {}]   ;;  %s1468_s5 = inlined_call_operand.vmem [shape: s32[128,1], index: 5, kind: input, shape index: {}]   ;;  %s1469_s6 = inlined_call_operand.hbm [shape: f32[1,128], index: 6, kind: output, shape index: {}]  }
   0x1   :  { %v61_v0 = vld [vmem:[%s1463_s0 + $0x78] sm:$0xff]  ;;  %v60_v1 = vld [vmem:[%s1463_s0 + $0x70] sm:$0xff]  ;;  %v207_v3 = vld [vmem:[%s1466_s3] sm:$0xff]  ;;  %796 = vset.pattern.permute.xlu1 %v823_v5  ;;  %795 = vset.pattern.permute.xlu0 %v823_v5 }
   0x2   :  { %702 = vmatprep.subr.mxu0 %v61_v0  ;;  %758 = vmatprep.subr.mxu1 %v61_v0  ;;  %v209_v2 = vld [vmem:[%s1466_s3 + $0x10] sm:$0xff]  ;;  %v59_v4 = vld [vmem:[%s1463_s0 + $0x68] sm:$0xff]  ;;  %v210_v6 = vld [vmem:[%s1466_s3 + $0x18] sm:$0xff] }
   0x3   :  { %703 = vmatpush3.xpose.msra.mxu0 %v61_v0  ;;  %774 = vmatpush3.xpose.msra.mxu1 %v61_v0  ;;  %v208_v7 = vld [vmem:[%s1466_s3 + $0x8] sm:$0xff]  ;;  %v58_v8 = vld [vmem:[%s1463_s0 + $0x60] sm:$0xff]  ;;  %v57_v13 = vld [vmem:[%s1463_s0 + $0x58] sm:$0xff] }
   0x4   :  { %704 = vmatprep.subr.mxu0 %v60_v1  ;;  %759 = vmatprep.subr.mxu1 %v60_v1  ;;  %v212_v9 = vld [vmem:[%s1466_s3 + $0x28] sm:$0xff]  ;;  %v211_v10 = vld [vmem:[%s1466_s3 + $0x20] sm:$0xff]  ;;  %v214_v14 = vld [vmem:[%s1466_s3 + $0x38] sm:$0xff] }
   0x5   :  { %235 = vperm.xlu1 %796, %v209_v2   ;;  %225 = vperm.xlu0 %795, %v207_v3   ;;  %v30_v11 = vld [vmem:[%s1464_s1] sm:$0xff]  ;;  %v213_v15 = vld [vmem:[%s1466_s3 + $0x30] sm:$0xff]  ;;  %v320_v17 = vld [vmem:[%s1468_s5 + $0x8] sm:$0xff] }
   0x6   :  { %v38_v12 = vld [vmem:[%s1464_s1 + $0x40] sm:$0xff]  ;;  %734 = vmatprep.mubr.f32.mxu0 %v30_v11  ;;  %v56_v16 = vld [vmem:[%s1463_s0 + $0x50] sm:$0xff]  ;;  %v55_v19 = vld [vmem:[%s1463_s0 + $0x48] sm:$0xff] }
   0x7   :  { %705 = vmatpush3.xpose.msra.mxu0 %v60_v1  ;;  %775 = vmatpush3.xpose.msra.mxu1 %v60_v1  ;;  %v319_v18 = vld [vmem:[%s1468_s5] sm:$0xff] }
   0x8   :  { %706 = vmatprep.subr.mxu0 %v59_v4  ;;  %760 = vmatprep.subr.mxu1 %v59_v4 }
   0x9   :  { %240 = vperm.xlu1 %796, %v210_v6   ;;  %230 = vperm.xlu0 %795, %v208_v7  }
   0xa   :  { %746 = vmatprep.mubr.f32.mxu1 %v38_v12 }
   0xb   :  { %707 = vmatpush3.xpose.msra.mxu0 %v59_v4  ;;  %776 = vmatpush3.xpose.msra.mxu1 %v59_v4 }
   0xc   :  { %708 = vmatprep.subr.mxu0 %v58_v8  ;;  %761 = vmatprep.subr.mxu1 %v58_v8 }
   0xd   :  { %250 = vperm.xlu1 %796, %v212_v9   ;;  %245 = vperm.xlu0 %795, %v211_v10  }
   0xf   :  { %709 = vmatpush3.xpose.msra.mxu0 %v58_v8  ;;  %777 = vmatpush3.xpose.msra.mxu1 %v58_v8 }
  0x10   :  { %710 = vmatprep.subr.mxu0 %v57_v13  ;;  %762 = vmatprep.subr.mxu1 %v57_v13 }
  0x11   :  { %260 = vperm.xlu1 %796, %v214_v14   ;;  %255 = vperm.xlu0 %795, %v213_v15  }
  0x13   :  { %711 = vmatpush3.xpose.msra.mxu0 %v57_v13  ;;  %778 = vmatpush3.xpose.msra.mxu1 %v57_v13 }
  0x14   :  { %712 = vmatprep.subr.mxu0 %v56_v16  ;;  %763 = vmatprep.subr.mxu1 %v56_v16 }
  0x15   :  { %340 = vperm.xlu1 %796, %v320_v17   ;;  %337 = vperm.xlu0 %795, %v319_v18  }
  0x16   :  { %11 = vsyncpa [#allocation5], 0  ;;  %v322_v20 = vld [vmem:[%s1468_s5 + $0x18] sm:$0xff]  ;;  %v321_v21 = vld [vmem:[%s1468_s5 + $0x10] sm:$0xff]  ;;  %v824_v1 = vmov -1e+30  }
  0x17   :  { %713 = vmatpush3.xpose.msra.mxu0 %v56_v16  ;;  %779 = vmatpush3.xpose.msra.mxu1 %v56_v16  ;;  %v54_v22 = vld [vmem:[%s1463_s0 + $0x40] sm:$0xff]  ;;  %v324_v23 = vld [vmem:[%s1468_s5 + $0x28] sm:$0xff]  ;;  %v53_v25 = vld [vmem:[%s1463_s0 + $0x38] sm:$0xff]  ;;  %28 = vst [vmem:[#allocation2] sm:$0x1] %v824_v1 }
  0x18   :  { %714 = vmatprep.subr.mxu0 %v55_v19  ;;  %764 = vmatprep.subr.mxu1 %v55_v19  ;;  %v323_v24 = vld [vmem:[%s1468_s5 + $0x20] sm:$0xff]  ;;  %v326_v26 = vld [vmem:[%s1468_s5 + $0x38] sm:$0xff]  ;;  %v325_v27 = vld [vmem:[%s1468_s5 + $0x30] sm:$0xff]  ;;  %v825_v2 = vmov 1e+30  }
  0x19   :  { %346 = vperm.xlu1 %796, %v322_v20   ;;  %343 = vperm.xlu0 %795, %v321_v21   ;;  %v52_v28 = vld [vmem:[%s1463_s0 + $0x30] sm:$0xff]  ;;  %v216_v29 = vld [vmem:[%s1466_s3 + $0x48] sm:$0xff]  ;;  %v215_v30 = vld [vmem:[%s1466_s3 + $0x40] sm:$0xff]  ;;  %29 = vst [vmem:[#allocation3] sm:$0x1] %v825_v2 }
  0x1a   :  { %v51_v31 = vld [vmem:[%s1463_s0 + $0x28] sm:$0xff]  ;;  %v218_v32 = vld [vmem:[%s1466_s3 + $0x58] sm:$0xff]  ;;  %v217_v33 = vld [vmem:[%s1466_s3 + $0x50] sm:$0xff] }
  0x1b   :  { %715 = vmatpush3.xpose.msra.mxu0 %v55_v19  ;;  %780 = vmatpush3.xpose.msra.mxu1 %v55_v19  ;;  %v50_v34 = vld [vmem:[%s1463_s0 + $0x20] sm:$0xff]  ;;  %v328_v35 = vld [vmem:[%s1468_s5 + $0x48] sm:$0xff]  ;;  %v49_v37 = vld [vmem:[%s1463_s0 + $0x18] sm:$0xff] }
  0x1c   :  { %716 = vmatprep.subr.mxu0 %v54_v22  ;;  %765 = vmatprep.subr.mxu1 %v54_v22  ;;  %v327_v36 = vld [vmem:[%s1468_s5 + $0x40] sm:$0xff]  ;;  %v330_v38 = vld [vmem:[%s1468_s5 + $0x58] sm:$0xff]  ;;  %v329_v39 = vld [vmem:[%s1468_s5 + $0x50] sm:$0xff] }
  0x1d   :  { %352 = vperm.xlu1 %796, %v324_v23   ;;  %349 = vperm.xlu0 %795, %v323_v24   ;;  %v48_v40 = vld [vmem:[%s1463_s0 + $0x10] sm:$0xff]  ;;  %v220_v41 = vld [vmem:[%s1466_s3 + $0x68] sm:$0xff]  ;;  %v219_v42 = vld [vmem:[%s1466_s3 + $0x60] sm:$0xff] }
  0x1e   :  { %v47_v43 = vld [vmem:[%s1463_s0 + $0x8] sm:$0xff]  ;;  %v222_v44 = vld [vmem:[%s1466_s3 + $0x78] sm:$0xff]  ;;  %v221_v45 = vld [vmem:[%s1466_s3 + $0x70] sm:$0xff] }
  0x1f   :  { %717 = vmatpush3.xpose.msra.mxu0 %v54_v22  ;;  %781 = vmatpush3.xpose.msra.mxu1 %v54_v22  ;;  %v46_v46 = vld [vmem:[%s1463_s0] sm:$0xff]  ;;  %v332_v47 = vld [vmem:[%s1468_s5 + $0x68] sm:$0xff]  ;;  %v32_v51 = vld [vmem:[%s1464_s1 + $0x10] sm:$0xff] }
  0x20   :  { %718 = vmatprep.subr.mxu0 %v53_v25  ;;  %766 = vmatprep.subr.mxu1 %v53_v25  ;;  %v331_v48 = vld [vmem:[%s1468_s5 + $0x60] sm:$0xff]  ;;  %v31_v49 = vld [vmem:[%s1464_s1 + $0x8] sm:$0xff]  ;;  %v40_v52 = vld [vmem:[%s1464_s1 + $0x50] sm:$0xff] }
  0x21   :  { %358 = vperm.xlu1 %796, %v326_v26   ;;  %355 = vperm.xlu0 %795, %v325_v27   ;;  %v39_v50 = vld [vmem:[%s1464_s1 + $0x48] sm:$0xff]  ;;  %v334_v53 = vld [vmem:[%s1468_s5 + $0x78] sm:$0xff]  ;;  %v333_v54 = vld [vmem:[%s1468_s5 + $0x70] sm:$0xff]  ;;  %v456_v27 = vlaneseq }
  0x22   :  { %v33_v55 = vld [vmem:[%s1464_s1 + $0x18] sm:$0xff]  ;;  %v34_v57 = vld [vmem:[%s1464_s1 + $0x20] sm:$0xff]  ;;  %v35_v59 = vld [vmem:[%s1464_s1 + $0x28] sm:$0xff] }
  0x23   :  { %719 = vmatpush3.xpose.msra.mxu0 %v53_v25  ;;  %782 = vmatpush3.xpose.msra.mxu1 %v53_v25  ;;  %v41_v56 = vld [vmem:[%s1464_s1 + $0x58] sm:$0xff]  ;;  %v42_v58 = vld [vmem:[%s1464_s1 + $0x60] sm:$0xff]  ;;  %v43_v60 = vld [vmem:[%s1464_s1 + $0x68] sm:$0xff] }
  0x24   :  { %720 = vmatprep.subr.mxu0 %v52_v28  ;;  %767 = vmatprep.subr.mxu1 %v52_v28  ;;  %v36_v61 = vld [vmem:[%s1464_s1 + $0x30] sm:$0xff]  ;;  %v37_v63 = vld [vmem:[%s1464_s1 + $0x38] sm:$0xff] }
  0x25   :  { %270 = vperm.xlu1 %796, %v216_v29   ;;  %265 = vperm.xlu0 %795, %v215_v30   ;;  %v44_v62 = vld [vmem:[%s1464_s1 + $0x70] sm:$0xff]  ;;  %v45_v0 = vld [vmem:[%s1464_s1 + $0x78] sm:$0xff]  ;;  %v457_v30 = vshrl.u32 %v456_v27, 7 }
  0x27   :  { %721 = vmatpush3.xpose.msra.mxu0 %v52_v28  ;;  %783 = vmatpush3.xpose.msra.mxu1 %v52_v28 }
  0x28   :  { %722 = vmatprep.subr.mxu0 %v51_v31  ;;  %768 = vmatprep.subr.mxu1 %v51_v31 }
  0x29   :  { %280 = vperm.xlu1 %796, %v218_v32   ;;  %275 = vperm.xlu0 %795, %v217_v33   ;;  %v458_v33 = vadd.s32 8, %v457_v30 }
  0x2b   :  { %723 = vmatpush3.xpose.msra.mxu0 %v51_v31  ;;  %784 = vmatpush3.xpose.msra.mxu1 %v51_v31 }
  0x2c   :  { %724 = vmatprep.subr.mxu0 %v50_v34  ;;  %769 = vmatprep.subr.mxu1 %v50_v34 }
  0x2d   :  { %364 = vperm.xlu1 %796, %v328_v35   ;;  %361 = vperm.xlu0 %795, %v327_v36   ;;  %v460_v35 = vadd.s32 24, %v457_v30  ;;  %v1111_v36 = vadd.s32 40, %v457_v30 }
  0x2f   :  { %725 = vmatpush3.xpose.msra.mxu0 %v50_v34  ;;  %785 = vmatpush3.xpose.msra.mxu1 %v50_v34  ;;  %v1109_v34 = vand.u32 127, %v456_v27 }
  0x30   :  { %726 = vmatprep.subr.mxu0 %v49_v37  ;;  %770 = vmatprep.subr.mxu1 %v49_v37 }
  0x31   :  { %370 = vperm.xlu1 %796, %v330_v38   ;;  %367 = vperm.xlu0 %795, %v329_v39   ;;  %v1115_v38 = vadd.s32 16, %v457_v30  ;;  %v466_v39 = vadd.s32 72, %v457_v30  ;;  %vm495_vm0 = vcmp.ne.s32.totalorder %v458_v33, %v1109_v34  ;;  %vm494_vm1 = vcmp.ne.s32.totalorder %v457_v30, %v1109_v34 }
  0x32   :  { %vm497_vm2 = vcmp.ne.s32.totalorder %v460_v35, %v1109_v34 }
  0x33   :  { %727 = vmatpush3.xpose.msra.mxu0 %v49_v37  ;;  %786 = vmatpush3.xpose.msra.mxu1 %v49_v37  ;;  %v1113_v37 = vadd.s32 32, %v457_v30  ;;  %vm503_vm7 = vcmp.ne.s32.totalorder %v466_v39, %v1109_v34 }
  0x34   :  { %728 = vmatprep.subr.mxu0 %v48_v40  ;;  %771 = vmatprep.subr.mxu1 %v48_v40 }
  0x35   :  { %290 = vperm.xlu1 %796, %v220_v41   ;;  %285 = vperm.xlu0 %795, %v219_v42   ;;  %v1119_v41 = vadd.s32 88, %v457_v30  ;;  %v1124_v42 = vld [vmem:[%s1467_s4] ss:$0 sm:$0xff] }
  0x37   :  { %729 = vmatpush3.xpose.msra.mxu0 %v48_v40  ;;  %787 = vmatpush3.xpose.msra.mxu1 %v48_v40  ;;  %v1117_v40 = vadd.s32 64, %v457_v30 }
  0x38   :  { %730 = vmatprep.subr.mxu0 %v47_v43  ;;  %772 = vmatprep.subr.mxu1 %v47_v43 }
  0x39   :  { %300 = vperm.xlu1 %796, %v222_v44   ;;  %295 = vperm.xlu0 %795, %v221_v45   ;;  %v1131_v44 = vadd.s32 104, %v457_v30  ;;  %vm502_vm8 = vcmp.ne.s32.totalorder %v1117_v40, %v1109_v34 }
  0x3b   :  { %731 = vmatpush3.xpose.msra.mxu0 %v47_v43  ;;  %788 = vmatpush3.xpose.msra.mxu1 %v47_v43  ;;  %v1126_v43 = vadd.s32 80, %v457_v30 }
  0x3c   :  { %732 = vmatprep.subr.mxu0 %v46_v46  ;;  %773 = vmatprep.subr.mxu1 %v46_v46 }
  0x3d   :  { %376 = vperm.xlu1 %796, %v332_v47   ;;  %373 = vperm.xlu0 %795, %v331_v48   ;;  %v1137_v47 = vadd.s32 56, %v457_v30  ;;  %v1139_v48 = vadd.s32 48, %v457_v30 }
  0x3f   :  { %733 = vmatpush3.xpose.msra.mxu0 %v46_v46  ;;  %789 = vmatpush3.xpose.msra.mxu1 %v46_v46  ;;  %vm500_vm14 = vcmp.ne.s32.totalorder %v1139_v48, %v1109_v34 }
  0x41   :  { %382 = vperm.xlu1 %796, %v334_v53   ;;  %379 = vperm.xlu0 %795, %v333_v54   ;;  %v1158_v53 = vadd.s32 96, %v457_v30  ;;  %v1160_v54 = vadd.s32 120, %v457_v30 }
  0x42   :  { %735 = vmatmul.mubr.f32.vlgmr.msra.gmra.mxu0 %v31_v49  ;;  %747 = vmatmul.mubr.f32.vlgmr.msra.gmra.mxu1 %v39_v50 }
  0x43   :  { %737 = vmatprep.mubr.f32.mxu0 %v32_v51  ;;  %749 = vmatprep.mubr.f32.mxu1 %v40_v52 }
  0x46   :  { %738 = vmatmul.mubr.f32.gmra.mxu0 %v33_v55  ;;  %750 = vmatmul.mubr.f32.gmra.mxu1 %v41_v56  ;;  %v1162_v55 = vadd.s32 112, %v457_v30 }
  0x47   :  { %740 = vmatprep.mubr.f32.mxu0 %v34_v57  ;;  %752 = vmatprep.mubr.f32.mxu1 %v42_v58 }
  0x4a   :  { %741 = vmatmul.mubr.f32.gmra.mxu0 %v35_v59  ;;  %753 = vmatmul.mubr.f32.gmra.mxu1 %v43_v60 }
  0x4b   :  { %743 = vmatprep.mubr.f32.mxu0 %v36_v61  ;;  %755 = vmatprep.mubr.f32.mxu1 %v44_v62 }
  0x4e   :  { %744 = vmatmul.mubr.f32.gmra.mxu0 %v37_v63  ;;  %756 = vmatmul.mubr.f32.gmra.mxu1 %v45_v0 }
  0x80   :  { %v1055_v3 = vpop.permute.xlu1 %235  ;;  %v1057_v4 = vpop.permute.xlu0 %225 }
  0x84   :  { %v1059_v5 = vpop.permute.xlu1 %240  ;;  %v1061_v6 = vpop.permute.xlu0 %230 }
  0x88   :  { %v1063_v7 = vpop.permute.xlu1 %250  ;;  %v1065_v8 = vpop.permute.xlu0 %245 }
  0x8c   :  { %v1067_v9 = vpop.permute.xlu1 %260  ;;  %v1069_v10 = vpop.permute.xlu0 %255 }
  0x90   :  { %v1071_v11 = vpop.permute.xlu1 %340  ;;  %v1073_v12 = vpop.permute.xlu0 %337 }
  0x91   :  { %vm389_vm5 = vcmp.eq.s32.totalorder %v1071_v11, %v1124_v42  ;;  %vm388_vm10 = vcmp.eq.s32.totalorder %v1073_v12, %v1124_v42 }
  0x92   :  { %vm1180_vm15 = vmand %vm389_vm5, %vm495_vm0 }
  0x93   :  { %vm1200_vm0 = vmand %vm388_vm10, %vm494_vm1 }
  0x94   :  { %v1075_v13 = vpop.permute.xlu1 %346  ;;  %v1077_v14 = vpop.permute.xlu0 %343 }
  0x95   :  { %vm391_vm12 = vcmp.eq.s32.totalorder %v1075_v13, %v1124_v42 }
  0x96   :  { %vm1219_vm1 = vmand %vm391_vm12, %vm497_vm2 }
  0x98   :  { %v1079_v15 = vpop.permute.xlu1 %352  ;;  %v1081_v16 = vpop.permute.xlu0 %349 }
  0x9c   :  { %v1083_v17 = vpop.permute.xlu1 %358  ;;  %v1085_v18 = vpop.permute.xlu0 %355 }
  0x9d   :  { %vm394_vm4 = vcmp.eq.s32.totalorder %v1085_v18, %v1124_v42 }
  0xa0   :  { %v271_v19 = vpop.permute.xlu1 %270  ;;  %v1087_v20 = vpop.permute.xlu0 %265 }
  0xa4   :  { %v1089_v21 = vpop.permute.xlu1 %280  ;;  %v1091_v22 = vpop.permute.xlu0 %275 }
  0xa8   :  { %v1093_v23 = vpop.permute.xlu1 %364  ;;  %v1095_v24 = vpop.permute.xlu0 %361 }
  0xa9   :  { %vm397_vm6 = vcmp.eq.s32.totalorder %v1093_v23, %v1124_v42  ;;  %vm396_vm13 = vcmp.eq.s32.totalorder %v1095_v24, %v1124_v42 }
  0xaa   :  { %vm1242_vm2 = vmand %vm397_vm6, %vm503_vm7  ;;  %vm509_vm7 = vcmp.ne.s32.totalorder %v1160_v54, %v1109_v34 }
  0xac   :  { %v1097_v25 = vpop.permute.xlu1 %370  ;;  %v1099_v26 = vpop.permute.xlu0 %367 }
  0xad   :  { %vm399_vm9 = vcmp.eq.s32.totalorder %v1097_v25, %v1124_v42  ;;  %vm398_vm11 = vcmp.eq.s32.totalorder %v1099_v26, %v1124_v42 }
  0xb0   :  { %v1101_v28 = vpop.permute.xlu1 %290  ;;  %v1103_v29 = vpop.permute.xlu0 %285 }
  0xb4   :  { %v1105_v31 = vpop.permute.xlu1 %300  ;;  %v1107_v32 = vpop.permute.xlu0 %295 }
  0xb8   :  { %v1141_v49 = vpop.permute.xlu1 %376  ;;  %v1143_v50 = vpop.permute.xlu0 %373 }
  0xb9   :  { %vm401_vm3 = vcmp.eq.s32.totalorder %v1141_v49, %v1124_v42 }
 0x102   :  { %v736_v45 = vpop.f32.mrf.mxu0  ;;  %v748_v46 = vpop.f32.mrf.mxu1 }
 0x103   :  { %v1171_v56 = vsub.f32 %v1061_v6, %v736_v45  ;;  %v1173_v57 = vsub.f32 %v271_v19, %v748_v46  ;;  %v1235_v6 = vpop.permute.xlu0 %379 }
 0x104   :  { %v128_v51 = vpop.f32.mrf.mxu0  ;;  %v168_v52 = vpop.f32.mrf.mxu1 }
 0x105   :  { %v1193_v61 = vsub.f32 %v1057_v4, %v128_v51  ;;  %v1209_v63 = vsub.f32 %v1087_v20, %v168_v52  ;;  %v405_v20 = vsel %vm389_vm5, 1e+30, %v1171_v56  ;;  %v527_v27 = vsel %vm1180_vm15, %v1171_v56, -1e+30  ;;  %vm1266_vm5 = vmand %vm396_vm13, %vm502_vm8 }
 0x106   :  { %v739_v58 = vpop.f32.mrf.mxu0  ;;  %v751_v59 = vpop.f32.mrf.mxu1  ;;  %v413_v30 = vsel %vm397_vm6, 1e+30, %v1173_v57  ;;  %vm1480_vm8 = vcmp.ne.s32.totalorder %v1111_v36, %v1109_v34  ;;  %vm1481_vm15 = vcmp.eq.s32.totalorder %v1079_v15, %v1124_v42 }
 0x107   :  { %v1212_v0 = vsub.f32 %v1059_v5, %v739_v58  ;;  %v1233_v5 = vpop.permute.xlu1 %382  ;;  %v1258_v33 = vsub.f32 %v1089_v21, %v751_v59  ;;  %v535_v21 = vsel %vm1242_vm2, %v1173_v57, -1e+30  ;;  %v404_v23 = vsel %vm388_vm10, 1e+30, %v1193_v61  ;;  %vm1291_vm6 = vmand %vm1481_vm15, %vm1480_vm8 }
 0x108   :  { %v138_v1 = vpop.f32.mrf.mxu0  ;;  %v178_v2 = vpop.f32.mrf.mxu1  ;;  %v526_v40 = vsel %vm1200_vm0, %v1193_v61, -1e+30  ;;  %vm403_vm10 = vcmp.eq.s32.totalorder %v1233_v5, %v1124_v42  ;;  %v534_v12 = vsel %vm1266_vm5, %v1209_v63, -1e+30  ;;  %vm1484_vm0 = vcmp.ne.s32.totalorder %v1119_v41, %v1109_v34  ;;  %vm1487_vm8 = vmmov %vm1481_vm15 }
 0x109   :  { %v407_v36 = vsel %vm391_vm12, 1e+30, %v1212_v0  ;;  %v305_v51 = vsub.f32 %v1055_v3, %v138_v1  ;;  %vm402_vm12 = vcmp.eq.s32.totalorder %v1235_v6, %v1124_v42  ;;  %v529_v3 = vsel %vm1219_vm1, %v1212_v0, -1e+30 }
 0x10a   :  { %v742_v35 = vpop.f32.mrf.mxu0  ;;  %v754_v39 = vpop.f32.mrf.mxu1  ;;  %v313_v13 = vsub.f32 %v1091_v22, %v178_v2  ;;  %vm1488_vm15 = vcmp.ne.s32.totalorder %v1113_v37, %v1109_v34  ;;  %v415_v22 = vsel %vm399_vm9, 1e+30, %v1258_v33  ;;  %vm1492_vm1 = vcmp.ne.s32.totalorder %v1115_v38, %v1109_v34 }
 0x10b   :  { %v308_v45 = vsub.f32 %v1063_v7, %v742_v35  ;;  %v412_v7 = vsel %vm396_vm13, 1e+30, %v1209_v63  ;;  %vm1317_vm13 = vmand %vm399_vm9, %vm1484_vm0  ;;  %vm1489_vm0 = vcmp.eq.s32.totalorder %v1081_v16, %v1124_v42  ;;  %v316_v37 = vsub.f32 %v1101_v28, %v754_v39 }
 0x10c   :  { %v148_v52 = vpop.f32.mrf.mxu0  ;;  %v188_v56 = vpop.f32.mrf.mxu1  ;;  %vm1339_vm5 = vmand %vm1489_vm0, %vm1488_vm15  ;;  %v537_v15 = vsel %vm1317_vm13, %v1258_v33, -1e+30  ;;  %vm1510_vm2 = vcmp.ne.s32.totalorder %v1162_v55, %v1109_v34 }
 0x10d   :  { %v409_v41 = vsel %vm1487_vm8, 1e+30, %v308_v45  ;;  %v307_v58 = vsub.f32 %v1065_v8, %v148_v52  ;;  %v531_v8 = vsel %vm1291_vm6, %v308_v45, -1e+30  ;;  %vm1493_vm8 = vcmp.eq.s32.totalorder %v1077_v14, %v1124_v42  ;;  %vm1496_vm9 = vmmov %vm1489_vm0 }
 0x10e   :  { %v745_v60 = vpop.f32.mrf.mxu0  ;;  %v757_v61 = vpop.f32.mrf.mxu1  ;;  %vm1359_vm15 = vmand %vm1493_vm8, %vm1492_vm1  ;;  %v421_v62 = vmin.f32 %v405_v20, %v409_v41  ;;  %vm1497_vm6 = vcmp.ne.s32.totalorder %v1126_v43, %v1109_v34  ;;  %v414_v14 = vsel %vm398_vm11, 1e+30, %v313_v13  ;;  %v543_v35 = vmax.f32 %v527_v27, %v531_v8 }
 0x10f   :  { %v408_v63 = vsel %vm1496_vm9, 1e+30, %v307_v58  ;;  %v530_v28 = vsel %vm1339_vm5, %v307_v58, -1e+30  ;;  %v310_v0 = vsub.f32 %v1067_v9, %v745_v60  ;;  %vm1375_vm13 = vmand %vm398_vm11, %vm1497_vm6  ;;  %v528_v1 = vsel %vm1359_vm15, %v305_v51, -1e+30 }
 0x110   :  { %vm1500_vm0 = vmmov %vm1493_vm8  ;;  %v420_v2 = vmin.f32 %v404_v23, %v408_v63  ;;  %v542_v4 = vmax.f32 %v526_v40, %v530_v28  ;;  %v158_v9 = vpop.f32.mrf.mxu0  ;;  %vm1501_vm5 = vcmp.ne.s32.totalorder %v1131_v44, %v1109_v34  ;;  %v536_v20 = vsel %vm1375_vm13, %v313_v13, -1e+30  ;;  %v198_v23 = vpop.f32.mrf.mxu1  ;;  %v441_v28 = vld [vmem:[#allocation3] sm:$0x1] }
 0x111   :  { %v406_v16 = vsel %vm1500_vm0, 1e+30, %v305_v51  ;;  %vm1390_vm1 = vmand %vm401_vm3, %vm1501_vm5  ;;  %vm1504_vm8 = vcmp.eq.s32.totalorder %v1083_v17, %v1124_v42  ;;  %v309_v44 = vsub.f32 %v1069_v10, %v158_v9  ;;  %vm1505_vm15 = vcmp.ne.s32.totalorder %v1137_v47, %v1109_v34  ;;  %v612_v9 = vld [vmem:[%s1465_s2] sm:$0x1]  ;;  %s827_s2 = smov [#allocation4]  }
 0x112   :  { %v411_v33 = vsel %vm1504_vm8, 1e+30, %v310_v0  ;;  %vm1506_vm9 = vmmov %vm1504_vm8  ;;  %v417_v26 = vsel %vm401_vm3, 1e+30, %v316_v37  ;;  %v539_v39 = vsel %vm1390_vm1, %v316_v37, -1e+30  ;;  %v315_v11 = vsub.f32 %v1103_v29, %v188_v56 }
 0x113   :  { %vm517_vm6 = vmand %vm1506_vm9, %vm1505_vm15  ;;  %v425_v40 = vmin.f32 %v421_v62, %v413_v30  ;;  %v424_v10 = vmin.f32 %v420_v2, %v412_v7  ;;  %v423_v45 = vmin.f32 %v407_v36, %v411_v33  ;;  %v546_v17 = vmax.f32 %v542_v4, %v534_v12  ;;  %s659_s26 = sshll.u32 %s827_s2, 4  ;;  %s660_s26 = int_to_ptr.vmem [resolvable:$true] %s659_s26 }
 0x114   :  { %v533_v46 = vsel %vm517_vm6, %v310_v0, -1e+30  ;;  %vm516_vm11 = vmand %vm394_vm4, %vm500_vm14  ;;  %v318_v49 = vsub.f32 %v1105_v31, %v757_v61  ;;  %v410_v29 = vsel %vm394_vm4, 1e+30, %v309_v44  ;;  %v317_v36 = vsub.f32 %v1107_v32, %v198_v23  ;;  %s801_s27 = scalar_lea.vmem %s660_s26, 16  ;;  %s805_s28 = scalar_lea.vmem %s660_s26, 32 }
 0x115   :  { %v545_v47 = vmax.f32 %v529_v3, %v533_v46  ;;  %v427_v27 = vmin.f32 %v423_v45, %v415_v22  ;;  %v422_v30 = vmin.f32 %v406_v16, %v410_v29  ;;  %v532_v7 = vsel %vm516_vm11, %v309_v44, -1e+30  ;;  %vm525_vm0 = vmand %vm403_vm10, %vm509_vm7  ;;  %v563_v16 = vld [vmem:[#allocation2] sm:$0x1]  ;;  %p802_p0 = scmp.ne.s32.totalorder %s660_s26, %s801_s27  ;;  %p806_p1 = scmp.lt.s32.totalorder %s660_s26, %s660_s26 }
 0x116   :  { %vm1507_vm3 = vcmp.ne.s32.totalorder %v1158_v53, %v1109_v34  ;;  %vm1508_vm13 = vcmp.eq.s32.totalorder %v1143_v50, %v1124_v42  ;;  %v547_v31 = vmax.f32 %v543_v35, %v535_v21  ;;  %v544_v12 = vmax.f32 %v528_v1, %v532_v7  ;;  %vm524_vm5 = vmand %vm402_vm12, %vm1510_vm2  ;;  %p807_p2 = scmp.lt.s32.totalorder %s805_s28, %s801_s27 }
 0x117   :  { %vm522_vm14 = vmand %vm1508_vm13, %vm1507_vm3  ;;  %v549_v48 = vmax.f32 %v545_v47, %v537_v15  ;;  %v429_v32 = vmin.f32 %v425_v40, %v417_v26  ;;  %v426_v19 = vmin.f32 %v422_v30, %v414_v14  ;;  %v419_v54 = vsel %vm403_vm10, 1e+30, %v318_v49 }
 0x118   :  { %vm1509_vm4 = vmmov %vm1508_vm13  ;;  %v538_v51 = vsel %vm522_vm14, %v315_v11, -1e+30  ;;  %v418_v57 = vsel %vm402_vm12, 1e+30, %v317_v36  ;;  %v548_v21 = vmax.f32 %v544_v12, %v536_v20  ;;  %v431_v52 = vmin.f32 %v427_v27, %v419_v54  ;;  %p808_p3 = por %p807_p2, %p806_p1 }
 0x119   :  { %v416_v18 = vsel %vm1509_vm4, 1e+30, %v315_v11  ;;  %v550_v50 = vmax.f32 %v546_v17, %v538_v51  ;;  %v541_v56 = vsel %vm525_vm0, %v318_v49, -1e+30  ;;  %v430_v24 = vmin.f32 %v426_v19, %v418_v57 }
 0x11a   :  { %v428_v53 = vmin.f32 %v424_v10, %v416_v18  ;;  %v540_v3 = vsel %vm524_vm5, %v317_v36, -1e+30  ;;  %v551_v13 = vmax.f32 %v547_v31, %v539_v39  ;;  %v553_v34 = vmax.f32 %v549_v48, %v541_v56  ;;  %p809_p4 = pnand %p808_p3, %p802_p0 }
 0x11b   :  { %v552_v55 = vmax.f32 %v548_v21, %v540_v3  ;;  %v433_v58 = vmin.f32 %v430_v24, %v431_v52  ;;  %v826_v11 = vmov 0.0  }
 0x11c   :  { %v432_v41 = vmin.f32 %v428_v53, %v429_v32  ;;  %v554_v59 = vmax.f32 %v550_v50, %v551_v13 }
 0x11d   :  { %v555_v22 = vmax.f32 %v552_v55, %v553_v34 }
 0x11e   :  { %v434_v15 = vmin.f32 %v432_v41, %v433_v58 }
 0x11f   :  { %v556_v8 = vmax.f32 %v554_v59, %v555_v22 }
 0x120   :  { %v435_v5 = vrot.slane %v434_v15, 4 }
 0x121   :  { %v557_v37 = vrot.slane %v556_v8, 4 }
 0x122   :  { %v436_v60 = vmin.f32 %v434_v15, %v435_v5 }
 0x123   :  { %v558_v61 = vmax.f32 %v556_v8, %v557_v37 }
 0x124   :  { %v437_v42 = vrot.slane %v436_v60, 2 }
 0x125   :  { %v559_v6 = vrot.slane %v558_v61, 2 }
 0x126   :  { %v438_v25 = vmin.f32 %v436_v60, %v437_v42 }
 0x127   :  { %v560_v62 = vmax.f32 %v558_v61, %v559_v6 }
 0x128   :  { %v439_v63 = vrot.slane %v438_v25, 1 }
 0x129   :  { %v561_v0 = vrot.slane %v560_v62, 1 }
 0x12a   :  { %v440_v38 = vmin.f32 %v438_v25, %v439_v63 }
 0x12b   :  { %v562_v1 = vmax.f32 %v560_v62, %v561_v0 }
 0x12c   :  { %v442_v2 = vmin.f32 %v441_v28, %v440_v38 }
 0x12d   :  { %v564_v4 = vmax.f32 %v563_v16, %v562_v1 }
 0x12e   :  { %443 = vst [vmem:[#allocation3] sm:$0x1] %v442_v2 }
 0x12f   :  { %565 = vst [vmem:[#allocation2] sm:$0x1] %v564_v4 }
 0x135   :  { %v617_v43 = vld [vmem:[#allocation3] sm:$0x1] }
 0x136   :  { %v613_v14 = vld [vmem:[#allocation2] sm:$0x1]  ;;  %v618_v20 = vmul.f32 2.0, %v617_v43 }
 0x137   :  { %v614_v33 = vmul.f32 2.0, %v613_v14 }
 0x138   :  { %v619_v44 = vadd.f32 %v618_v20, %v612_v9 }
 0x139   :  { %v615_v35 = vadd.f32 %v614_v33, %v612_v9 }
 0x13a   :  { %v620_v26 = vmax.f32 %v619_v44, 0.0 }
 0x13b   :  { %v616_v39 = vmax.f32 %v615_v35, 0.0 }
 0x13c   :  { %vm624_vm7 = vcmp.eq.f32.partialorder %v620_v26, 0.0 }
 0x13d   :  { %vm621_vm10 = vcmp.eq.f32.partialorder %v616_v39, 0.0  ;;  %v669_v23 = vsel %vm624_vm7, 1.0, %v826_v11 }
 0x13e   :  { %v668_v40 = vsel %vm621_vm10, 1.0, %v826_v11  ;;  %v639_v10 = vmul.f32 1e-16, %v669_v23  ;;  %v638_v30 = vsub.f32 1.0, %v669_v23 }
 0x13f   :  { %v628_v45 = vmul.f32 1e-16, %v668_v40  ;;  %v627_v18 = vsub.f32 1.0, %v668_v40 }
 0x140   :  { %v640_v46 = vadd.f32 %v639_v10, %v620_v26 }
 0x141   :  { %v629_v17 = vadd.f32 %v628_v45, %v616_v39 }
 0x142   :  { %797 = vrsqrt.f32 %v640_v46  ;;  %vm643_vm12 = vcmp.eq.f32.partialorder %v640_v46, inf  ;;  %v646_v7 = vand.u32 2147483648, %v640_v46  ;;  %vm645_vm8 = vcmp.eq.f32.partialorder %v640_v46, 0.0 }
 0x143   :  { %799 = vrsqrt.f32 %v629_v17  ;;  %vm632_vm1 = vcmp.eq.f32.partialorder %v629_v17, inf  ;;  %v635_v36 = vand.u32 2147483648, %v629_v17  ;;  %vm634_vm15 = vcmp.eq.f32.partialorder %v629_v17, 0.0 }
 0x14f   :  { %v798_v47 = vpop.eup %797 }
 0x150   :  { %v800_v49 = vpop.eup %799  ;;  %v642_v29 = vmul.f32 %v798_v47, %v640_v46 }
 0x151   :  { %v631_v27 = vmul.f32 %v800_v49, %v629_v17 }
 0x152   :  { %v644_v31 = vsel %vm643_vm12, %v640_v46, %v642_v29 }
 0x153   :  { %v633_v48 = vsel %vm632_vm1, %v629_v17, %v631_v27  ;;  %v647_v12 = vsel %vm645_vm8, %v646_v7, %v644_v31 }
 0x154   :  { %v636_v32 = vsel %vm634_vm15, %v635_v36, %v633_v48  ;;  %v648_v53 = vmul.f32 %v647_v12, %v638_v30 }
 0x155   :  { %v637_v51 = vmul.f32 %v636_v32, %v627_v18 }
 0x157   :  { %v649_v19 = vsub.f32 %v637_v51, %v648_v53 }
 0x159   :  { %v650_v50 = vadd.f32 5.0, %v649_v19 }
 0x15b   :  { %v651_v54 = vmax.f32 %v650_v50, 0.0 }
 0x15d   :  { %652 = vst [vmem:[#allocation4] sm:$0x1] %v651_v54 }
 0x15e   :  { %812 = shalt.err (!%p809_p4)
}
 0x15f   :  { %662 = dma.vmem_to_hbm [thread:$0]  %s660_s26, 16, %s1469_s6, [#allocation5]  }
 0x160   :  { %821 = dma.done.wait [#allocation5], 16  }
 0x161   :  { %822 = vsyncadd [#allocation5], 4294967280 }
 0x162   :  { %666 = vsyncpa [#allocation5], 1 }

</bundles_post_ra>
